<compile_context>
chip_gen: v7x
topology: tpu7x:2x2x1
jax: 0.10.0
libtpu: 0.0.40
codegen_flags: <defaults>
</compile_context>

<pallas_src>
import jax
import jax.numpy as jnp
from jax import lax
from jax.experimental import pallas as pl
from jax.experimental.pallas import tpu as pltpu


def embnet_onehot_kernel(idx_ref, l_ref, b_ref, o_ref):
    """One-hot gather-matmul + bias + log_softmax.

    idx_ref: (TB, S)      int32  VMEM  token indices for this batch tile
    l_ref:   (S*Vp, N)    f32    VMEM  per-position logit tables (zero-padded rows)
    b_ref:   (1, N)       f32    VMEM  Linear bias
    o_ref:   (TB, N)      f32    VMEM  log-probabilities
    """
    tb, s_len = idx_ref.shape
    k_dim, _ = l_ref.shape
    vp = k_dim // s_len

    idx = idx_ref[...]                                              # (TB, S) int32
    iota_k = lax.broadcasted_iota(jnp.int32, (tb, k_dim), 1)        # (TB, S*Vp)

    # Build the (TB, S*Vp) one-hot over the combined (position, vocab) axis with
    # S broadcast VPU compares.  Keys are disjoint per position, so the sum of
    # the 0/1 masks is an exact one-hot; indices >= V contribute zero rows.
    oh = jnp.zeros((tb, k_dim), dtype=jnp.float32)
    for s in range(s_len):
        key_s = idx[:, s:s + 1] + s * vp                            # (TB, 1)
        oh = oh + (iota_k == key_s).astype(jnp.float32)

    # Single lane-dense MXU matmul: (TB, S*Vp) @ (S*Vp, N).
    logits = jnp.dot(oh, l_ref[...], preferred_element_type=jnp.float32)
    logits = logits + b_ref[...]

    # Numerically stable log_softmax along the last dim (VPU/XLU/EUP only).
    m = jnp.max(logits, axis=-1, keepdims=True)
    shifted = logits - m
    lse = jnp.log(jnp.sum(jnp.exp(shifted), axis=-1, keepdims=True))
    o_ref[...] = shifted - lse


def embnet_forward(x_idx, emb_table, w_t, b):
    """x_idx: (B, S) int32, emb_table: (V, H1) f32, w_t: (H2, N) f32, b: (N,) f32."""
    B, S = x_idx.shape
    V, H1 = emb_table.shape
    H2, N = w_t.shape
    assert S * H1 == H2, "flattened embedding size must equal Linear in_features"

    # Host-side weight prep (one-time / jit-fused for reused inference weights):
    # per-position logit tables L[s, v, n] = sum_h emb[v, h] * W[s*H1 + h, n],
    # padded along V to a lane multiple and flattened to (S*Vp, N).
    Vp = ((V + 127) // 128) * 128
    K = S * Vp
    w_shp = w_t.reshape(S, H1, N)
    L = jnp.einsum('vh,shn->svn', emb_table, w_shp,
                   precision=lax.Precision.HIGHEST)                 # (S, V, N)
    L_flat = jnp.pad(L, ((0, 0), (0, Vp - V), (0, 0))).reshape(K, N)
    b2d = b.reshape(1, N).astype(jnp.float32)

    # Batch tile: one grid step at B=2; becomes a parallel axis (v7x megacore)
    # once B scales.
    TB = B if B <= 128 else 128
    assert B % TB == 0, "batch must divide the batch tile"

    cost = pl.CostEstimate(
        flops=2 * B * K * N + 4 * B * N,          # one-hot matmul + softmax adds
        transcendentals=B * (N + 1),              # N exps + 1 log per row
        bytes_accessed=4 * (x_idx.size + L_flat.size + b2d.size + B * N),
    )

    return pl.pallas_call(
        embnet_onehot_kernel,
        out_shape=jax.ShapeDtypeStruct((B, N), jnp.float32),
        grid=(B // TB,),
        in_specs=[
            pl.BlockSpec((TB, S), lambda i: (i, 0)),     # indices (per batch tile)
            pl.BlockSpec((K, N), lambda i: (0, 0)),      # logit tables (resident)
            pl.BlockSpec((1, N), lambda i: (0, 0)),      # bias
        ],
        out_specs=pl.BlockSpec((TB, N), lambda i: (i, 0)),
        compiler_params=pltpu.CompilerParams(
            dimension_semantics=("parallel",)),
        cost_estimate=cost,
    )(x_idx.astype(jnp.int32), L_flat, b2d)


def reference_forward(x_idx, emb_table, w_t, b):
    embeds = jnp.take(emb_table, x_idx, axis=0).reshape(x_idx.shape[0], -1)
    logits = embeds @ w_t + b
    return jax.nn.log_softmax(logits, axis=-1)


if __name__ == "__main__":
    # Module hyperparameters: emb_size (vocab), hidden_size1 (emb dim),
    # hidden_size2 = 200 (Linear in_features). Forward implies seq * hidden1 == 200.
    emb_size = 50       # vocab size
    hidden_size1 = 25   # embedding dim
    hidden_size2 = 200  # Linear in_features
    batch = 2
    seq = hidden_size2 // hidden_size1  # 8

    key = jax.random.PRNGKey(0)
    k_emb, k_w, k_b, k_x = jax.random.split(key, 4)

    # Deterministic parameter init (PyTorch-style distributions).
    emb_table = jax.random.normal(k_emb, (emb_size, hidden_size1), dtype=jnp.float32)
    bound = 1.0 / jnp.sqrt(hidden_size2)
    # nn.Linear weight is (3, hidden2); store transposed for the contraction.
    w = jax.random.uniform(k_w, (3, hidden_size2), minval=-bound, maxval=bound,
                           dtype=jnp.float32)
    b = jax.random.uniform(k_b, (3,), minval=-bound, maxval=bound, dtype=jnp.float32)
    w_t = w.T  # (hidden2, 3)

    x = jax.random.randint(k_x, (batch, seq), 0, emb_size, dtype=jnp.int32)

    out = embnet_forward(x, emb_table, w_t, b)
    out = jax.block_until_ready(out)

    ref = reference_forward(x, emb_table, w_t, b)
    assert out.shape == (batch, 3)
    assert jnp.allclose(out, ref, atol=1e-5, rtol=1e-5), "mismatch vs reference"

    print("KERNEL_OK")
</pallas_src>

<mosaic_0001>
module attributes {stable_mosaic.version = 11 : i64} {
  func.func @embnet_onehot_kernel(%arg0: i32, %arg1: memref<2x8xi32, #tpu.memory_space<vmem>>, %arg2: memref<1024x3xf32, #tpu.memory_space<vmem>>, %arg3: memref<1x3xf32, #tpu.memory_space<vmem>>, %arg4: memref<2x3xf32, #tpu.memory_space<vmem>>) attributes {dimension_semantics = [#tpu.dimension_semantics<parallel>], iteration_bounds = array<i64: 1>, scalar_prefetch = 0 : i64, scratch_operands = 0 : i64, tpu.core_type = #tpu.core_type<tc>, window_params = [{transform_indices = @transform_0, window_bounds = array<i64: 2, 8>}, {pipeline_mode = #tpu.pipeline_mode<synchronous>, transform_indices = @transform_1, window_bounds = array<i64: 1024, 3>}, {pipeline_mode = #tpu.pipeline_mode<synchronous>, transform_indices = @transform_2, window_bounds = array<i64: 1, 3>}, {transform_indices = @transform_3, window_bounds = array<i64: 2, 3>}]} {
    %c0 = arith.constant 0 : index
    %c0_0 = arith.constant 0 : index
    %0 = vector.load %arg1[%c0, %c0_0] : memref<2x8xi32, #tpu.memory_space<vmem>>, vector<2x8xi32>
    %1 = tpu.iota {dimensions = array<i32: 1>} : vector<2x1024xi32>
    %cst = arith.constant 0.000000e+00 : f32
    %2 = vector.broadcast %cst : f32 to vector<2x1024xf32>
    %3 = vector.extract_strided_slice %0 {offsets = [0, 0], sizes = [2, 1], strides = [1, 1]} : vector<2x8xi32> to vector<2x1xi32>
    %c0_i32 = arith.constant 0 : i32
    %4 = vector.broadcast %c0_i32 : i32 to vector<2x1xi32>
    %5 = arith.addi %3, %4 : vector<2x1xi32>
    %6 = vector.broadcast %5 : vector<2x1xi32> to vector<2x1024xi32>
    %7 = arith.cmpi eq, %1, %6 : vector<2x1024xi32>
    %8 = arith.extui %7 : vector<2x1024xi1> to vector<2x1024xi32>
    %9 = arith.sitofp %8 : vector<2x1024xi32> to vector<2x1024xf32>
    %10 = arith.addf %2, %9 : vector<2x1024xf32>
    %11 = vector.extract_strided_slice %0 {offsets = [0, 1], sizes = [2, 1], strides = [1, 1]} : vector<2x8xi32> to vector<2x1xi32>
    %c128_i32 = arith.constant 128 : i32
    %12 = vector.broadcast %c128_i32 : i32 to vector<2x1xi32>
    %13 = arith.addi %11, %12 : vector<2x1xi32>
    %14 = vector.broadcast %13 : vector<2x1xi32> to vector<2x1024xi32>
    %15 = arith.cmpi eq, %1, %14 : vector<2x1024xi32>
    %16 = arith.extui %15 : vector<2x1024xi1> to vector<2x1024xi32>
    %17 = arith.sitofp %16 : vector<2x1024xi32> to vector<2x1024xf32>
    %18 = arith.addf %10, %17 : vector<2x1024xf32>
    %19 = vector.extract_strided_slice %0 {offsets = [0, 2], sizes = [2, 1], strides = [1, 1]} : vector<2x8xi32> to vector<2x1xi32>
    %c256_i32 = arith.constant 256 : i32
    %20 = vector.broadcast %c256_i32 : i32 to vector<2x1xi32>
    %21 = arith.addi %19, %20 : vector<2x1xi32>
    %22 = vector.broadcast %21 : vector<2x1xi32> to vector<2x1024xi32>
    %23 = arith.cmpi eq, %1, %22 : vector<2x1024xi32>
    %24 = arith.extui %23 : vector<2x1024xi1> to vector<2x1024xi32>
    %25 = arith.sitofp %24 : vector<2x1024xi32> to vector<2x1024xf32>
    %26 = arith.addf %18, %25 : vector<2x1024xf32>
    %27 = vector.extract_strided_slice %0 {offsets = [0, 3], sizes = [2, 1], strides = [1, 1]} : vector<2x8xi32> to vector<2x1xi32>
    %c384_i32 = arith.constant 384 : i32
    %28 = vector.broadcast %c384_i32 : i32 to vector<2x1xi32>
    %29 = arith.addi %27, %28 : vector<2x1xi32>
    %30 = vector.broadcast %29 : vector<2x1xi32> to vector<2x1024xi32>
    %31 = arith.cmpi eq, %1, %30 : vector<2x1024xi32>
    %32 = arith.extui %31 : vector<2x1024xi1> to vector<2x1024xi32>
    %33 = arith.sitofp %32 : vector<2x1024xi32> to vector<2x1024xf32>
    %34 = arith.addf %26, %33 : vector<2x1024xf32>
    %35 = vector.extract_strided_slice %0 {offsets = [0, 4], sizes = [2, 1], strides = [1, 1]} : vector<2x8xi32> to vector<2x1xi32>
    %c512_i32 = arith.constant 512 : i32
    %36 = vector.broadcast %c512_i32 : i32 to vector<2x1xi32>
    %37 = arith.addi %35, %36 : vector<2x1xi32>
    %38 = vector.broadcast %37 : vector<2x1xi32> to vector<2x1024xi32>
    %39 = arith.cmpi eq, %1, %38 : vector<2x1024xi32>
    %40 = arith.extui %39 : vector<2x1024xi1> to vector<2x1024xi32>
    %41 = arith.sitofp %40 : vector<2x1024xi32> to vector<2x1024xf32>
    %42 = arith.addf %34, %41 : vector<2x1024xf32>
    %43 = vector.extract_strided_slice %0 {offsets = [0, 5], sizes = [2, 1], strides = [1, 1]} : vector<2x8xi32> to vector<2x1xi32>
    %c640_i32 = arith.constant 640 : i32
    %44 = vector.broadcast %c640_i32 : i32 to vector<2x1xi32>
    %45 = arith.addi %43, %44 : vector<2x1xi32>
    %46 = vector.broadcast %45 : vector<2x1xi32> to vector<2x1024xi32>
    %47 = arith.cmpi eq, %1, %46 : vector<2x1024xi32>
    %48 = arith.extui %47 : vector<2x1024xi1> to vector<2x1024xi32>
    %49 = arith.sitofp %48 : vector<2x1024xi32> to vector<2x1024xf32>
    %50 = arith.addf %42, %49 : vector<2x1024xf32>
    %51 = vector.extract_strided_slice %0 {offsets = [0, 6], sizes = [2, 1], strides = [1, 1]} : vector<2x8xi32> to vector<2x1xi32>
    %c768_i32 = arith.constant 768 : i32
    %52 = vector.broadcast %c768_i32 : i32 to vector<2x1xi32>
    %53 = arith.addi %51, %52 : vector<2x1xi32>
    %54 = vector.broadcast %53 : vector<2x1xi32> to vector<2x1024xi32>
    %55 = arith.cmpi eq, %1, %54 : vector<2x1024xi32>
    %56 = arith.extui %55 : vector<2x1024xi1> to vector<2x1024xi32>
    %57 = arith.sitofp %56 : vector<2x1024xi32> to vector<2x1024xf32>
    %58 = arith.addf %50, %57 : vector<2x1024xf32>
    %59 = vector.extract_strided_slice %0 {offsets = [0, 7], sizes = [2, 1], strides = [1, 1]} : vector<2x8xi32> to vector<2x1xi32>
    %c896_i32 = arith.constant 896 : i32
    %60 = vector.broadcast %c896_i32 : i32 to vector<2x1xi32>
    %61 = arith.addi %59, %60 : vector<2x1xi32>
    %62 = vector.broadcast %61 : vector<2x1xi32> to vector<2x1024xi32>
    %63 = arith.cmpi eq, %1, %62 : vector<2x1024xi32>
    %64 = arith.extui %63 : vector<2x1024xi1> to vector<2x1024xi32>
    %65 = arith.sitofp %64 : vector<2x1024xi32> to vector<2x1024xf32>
    %66 = arith.addf %58, %65 : vector<2x1024xf32>
    %c0_1 = arith.constant 0 : index
    %c0_2 = arith.constant 0 : index
    %67 = vector.load %arg2[%c0_1, %c0_2] : memref<1024x3xf32, #tpu.memory_space<vmem>>, vector<1024x3xf32>
    %cst_3 = arith.constant dense<0.000000e+00> : vector<2x3xf32>
    %68 = tpu.matmul %66, %67, %cst_3 {dimension_numbers = #tpu.dot_dimension_numbers<[1], [0], [0], [1], [0, 0, 1, 1], [], []>} : vector<2x1024xf32>, vector<1024x3xf32>, vector<2x3xf32> -> vector<2x3xf32>
    %c0_4 = arith.constant 0 : index
    %c0_5 = arith.constant 0 : index
    %69 = vector.load %arg3[%c0_4, %c0_5] : memref<1x3xf32, #tpu.memory_space<vmem>>, vector<1x3xf32>
    %70 = vector.broadcast %69 : vector<1x3xf32> to vector<2x3xf32>
    %71 = arith.addf %68, %70 : vector<2x3xf32>
    %cst_6 = arith.constant dense<0xFF800000> : vector<2xf32>
    %72 = vector.multi_reduction <maximumf>, %71, %cst_6 [1] : vector<2x3xf32> to vector<2xf32>
    %73 = vector.shape_cast %72 : vector<2xf32> to vector<2x1xf32>
    %74 = vector.broadcast %73 : vector<2x1xf32> to vector<2x3xf32>
    %75 = arith.subf %71, %74 : vector<2x3xf32>
    %76 = math.exp %75 : vector<2x3xf32>
    %cst_7 = arith.constant dense<0.000000e+00> : vector<2xf32>
    %77 = vector.multi_reduction <add>, %76, %cst_7 [1] : vector<2x3xf32> to vector<2xf32>
    %78 = vector.shape_cast %77 : vector<2xf32> to vector<2x1xf32>
    %79 = math.log %78 : vector<2x1xf32>
    %80 = vector.broadcast %79 : vector<2x1xf32> to vector<2x3xf32>
    %81 = arith.subf %75, %80 : vector<2x3xf32>
    %c0_8 = arith.constant 0 : index
    %c0_9 = arith.constant 0 : index
    %82 = vector.load %arg4[%c0_8, %c0_9] : memref<2x3xf32, #tpu.memory_space<vmem>>, vector<2x3xf32>
    tpu.vector_store %arg4[%c0_8, %c0_9], %81 {strides = array<i32>} : memref<2x3xf32, #tpu.memory_space<vmem>>, vector<2x3xf32>,
    return
  }
  func.func @transform_0(%arg0: i32) -> (i32, i32) {
    %c0_i32 = arith.constant 0 : i32
    %c0_i32_0 = arith.constant 0 : i32
    return %arg0, %c0_i32 : i32, i32
  }
  func.func @transform_1(%arg0: i32) -> (i32, i32) {
    %c0_i32 = arith.constant 0 : i32
    %c0_i32_0 = arith.constant 0 : i32
    %c0_i32_1 = arith.constant 0 : i32
    return %c0_i32, %c0_i32_0 : i32, i32
  }
  func.func @transform_2(%arg0: i32) -> (i32, i32) {
    %c0_i32 = arith.constant 0 : i32
    %c0_i32_0 = arith.constant 0 : i32
    %c0_i32_1 = arith.constant 0 : i32
    return %c0_i32, %c0_i32_0 : i32, i32
  }
  func.func @transform_3(%arg0: i32) -> (i32, i32) {
    %c0_i32 = arith.constant 0 : i32
    %c0_i32_0 = arith.constant 0 : i32
    return %arg0, %c0_i32 : i32, i32
  }
}

</mosaic_0001>

<bundles_post_ra>
// kernel: tpu_custom_call.1
= control target key start
LH: loop header
LB: loop body
LE: loop exit
PB: predicated region body
PF: predicated region fallthrough
CT: control target
= control target key end

     0   :  { %v1135_v1 = vmov 0   ;;  %v1136_v2 = vmov 2   ;;  %v1137_v23 = vmov 1   ;;  %v1138_v28 = vmov 3   ;;  %s1991_s0 = inlined_call_operand.vmem [shape: s32[2,8], index: 0, kind: input, shape index: {}]   ;;  %s1992_s1 = inlined_call_operand.vmem [shape: f32[1024,3], index: 1, kind: input, shape index: {}]   ;;  %s1993_s2 = inlined_call_operand.vmem [shape: f32[1,3], index: 2, kind: input, shape index: {}]   ;;  %s1994_s3 = inlined_call_operand.hbm [shape: f32[2,3], index: 3, kind: output, shape index: {}]  }
   0x1   :  { %v1168_v0 = vld [vmem:[%s1991_s0] sm:$0x3]  ;;  %1098 = vset.pattern.permute.xlu0 %v1135_v1  ;;  %1100 = vset.pattern.permute.xlu1 %v1136_v2  ;;  %v329_v5 = vld [vmem:[%s1992_s1 + $0x88] sm:$0xff]  ;;  %v330_v17 = vld [vmem:[%s1992_s1 + $0x90] sm:$0xff]  ;;  %v1139_v41 = vmov 5   ;;  %v1140_v46 = vmov 4  }
   0x2   :  { %v96_v3 = vadd.s32 256, %v1168_v0  ;;  %v328_v4 = vld [vmem:[%s1992_s1 + $0x80] sm:$0xff]  ;;  %26 = vperm.xlu0 %1098, %v1168_v0   ;;  %v361_v7 = vld [vmem:[%s1992_s1 + $0x188] sm:$0xff]  ;;  %v60_v8 = vadd.s32 128, %v1168_v0  ;;  %v132_v13 = vadd.s32 384, %v1168_v0  ;;  %v331_v18 = vld [vmem:[%s1992_s1 + $0x98] sm:$0xff] }
   0x3   :  { %v360_v6 = vld [vmem:[%s1992_s1 + $0x180] sm:$0xff]  ;;  %v960_v9 = vpack.c.bf16 %v329_v5, %v328_v4  ;;  %v313_v11 = vld [vmem:[%s1992_s1 + $0x8] sm:$0xff]  ;;  %v964_v20 = vpack.c.bf16 %v331_v18, %v330_v17  ;;  %v362_v21 = vld [vmem:[%s1992_s1 + $0x190] sm:$0xff]  ;;  %v204_v32 = vadd.s32 640, %v1168_v0  ;;  %v168_v35 = vadd.s32 512, %v1168_v0 }
   0x4   :  { %98 = vperm.xlu1 %1100, %v96_v3   ;;  %v312_v10 = vld [vmem:[%s1992_s1] sm:$0xff]  ;;  %v992_v14 = vpack.c.bf16 %v361_v7, %v360_v6  ;;  %v345_v16 = vld [vmem:[%s1992_s1 + $0x108] sm:$0xff]  ;;  %v363_v22 = vld [vmem:[%s1992_s1 + $0x198] sm:$0xff]  ;;  %v240_v51 = vadd.s32 768, %v1168_v0  ;;  %v1141_v61 = vmov 7   ;;  %v1142_v62 = vmov 6  }
   0x5   :  { %v344_v12 = vld [vmem:[%s1992_s1 + $0x100] sm:$0xff]  ;;  %v962_v15 = vpack.c.bf16 %v313_v11, %v312_v10  ;;  %961 = vmatprep.subr.bf16.mxu0 %v960_v9  ;;  %v996_v24 = vpack.c.bf16 %v363_v22, %v362_v21  ;;  %v314_v25 = vld [vmem:[%s1992_s1 + $0x10] sm:$0xff]  ;;  %v315_v26 = vld [vmem:[%s1992_s1 + $0x18] sm:$0xff]  ;;  %v276_v7 = vadd.s32 896, %v1168_v0 }
   0x6   :  { %v994_v19 = vpack.c.bf16 %v345_v16, %v344_v12  ;;  %1099 = vset.pattern.permute.xlu0 %v1137_v23  ;;  %993 = vmatprep.subr.bf16.mxu1 %v992_v14  ;;  %v346_v27 = vld [vmem:[%s1992_s1 + $0x110] sm:$0xff]  ;;  %v347_v29 = vld [vmem:[%s1992_s1 + $0x118] sm:$0xff]  ;;  %v332_v30 = vld [vmem:[%s1992_s1 + $0xa0] sm:$0xff]  ;;  %v966_v36 = vpack.c.bf16 %v315_v26, %v314_v25 }
   0x7   :  { %62 = vperm.xlu0 %1099, %v60_v8   ;;  %v333_v31 = vld [vmem:[%s1992_s1 + $0xa8] sm:$0xff]  ;;  %963 = vmatpush3.bf16.msra.mxu0 %v962_v15  ;;  %v364_v33 = vld [vmem:[%s1992_s1 + $0x1a0] sm:$0xff]  ;;  %v998_v37 = vpack.c.bf16 %v347_v29, %v346_v27  ;;  %v334_v45 = vld [vmem:[%s1992_s1 + $0xb0] sm:$0xff] }
   0x8   :  { %1101 = vset.pattern.permute.xlu1 %v1138_v28  ;;  %v365_v34 = vld [vmem:[%s1992_s1 + $0x1a8] sm:$0xff]  ;;  %995 = vmatpush3.bf16.msra.mxu1 %v994_v19  ;;  %v968_v38 = vpack.c.bf16 %v333_v31, %v332_v30  ;;  %v316_v39 = vld [vmem:[%s1992_s1 + $0x20] sm:$0xff]  ;;  %v335_v47 = vld [vmem:[%s1992_s1 + $0xb8] sm:$0xff] }
   0x9   :  { %134 = vperm.xlu1 %1101, %v132_v13   ;;  %965 = vmatprep.subr.bf16.mxu0 %v964_v20  ;;  %v317_v40 = vld [vmem:[%s1992_s1 + $0x28] sm:$0xff]  ;;  %v1000_v42 = vpack.c.bf16 %v365_v34, %v364_v33  ;;  %v348_v43 = vld [vmem:[%s1992_s1 + $0x120] sm:$0xff]  ;;  %v366_v48 = vld [vmem:[%s1992_s1 + $0x1b0] sm:$0xff]  ;;  %v972_v55 = vpack.c.bf16 %v335_v47, %v334_v45 }
   0xa   :  { %997 = vmatprep.subr.bf16.mxu1 %v996_v24  ;;  %v349_v44 = vld [vmem:[%s1992_s1 + $0x128] sm:$0xff]  ;;  %v367_v49 = vld [vmem:[%s1992_s1 + $0x1b8] sm:$0xff]  ;;  %v970_v50 = vpack.c.bf16 %v317_v40, %v316_v39  ;;  %v318_v53 = vld [vmem:[%s1992_s1 + $0x30] sm:$0xff] }
   0xb   :  { %1103 = vset.pattern.permute.xlu0 %v1139_v41  ;;  %967 = vmatpush3.bf16.msra.mxu0 %v966_v36  ;;  %v1002_v52 = vpack.c.bf16 %v349_v44, %v348_v43  ;;  %v319_v54 = vld [vmem:[%s1992_s1 + $0x38] sm:$0xff]  ;;  %v1004_v56 = vpack.c.bf16 %v367_v49, %v366_v48  ;;  %v350_v57 = vld [vmem:[%s1992_s1 + $0x130] sm:$0xff]  ;;  %v336_v59 = vld [vmem:[%s1992_s1 + $0xc0] sm:$0xff] }
   0xc   :  { %206 = vperm.xlu0 %1103, %v204_v32   ;;  %999 = vmatpush3.bf16.msra.mxu1 %v998_v37  ;;  %v351_v58 = vld [vmem:[%s1992_s1 + $0x138] sm:$0xff]  ;;  %v337_v60 = vld [vmem:[%s1992_s1 + $0xc8] sm:$0xff]  ;;  %v974_v63 = vpack.c.bf16 %v319_v54, %v318_v53  ;;  %v368_v1 = vld [vmem:[%s1992_s1 + $0x1c0] sm:$0xff] }
   0xd   :  { %1102 = vset.pattern.permute.xlu1 %v1140_v46  ;;  %969 = vmatprep.subr.bf16.mxu0 %v968_v38  ;;  %v369_v2 = vld [vmem:[%s1992_s1 + $0x1c8] sm:$0xff]  ;;  %v1006_v3 = vpack.c.bf16 %v351_v58, %v350_v57  ;;  %v320_v4 = vld [vmem:[%s1992_s1 + $0x40] sm:$0xff]  ;;  %v976_v8 = vpack.c.bf16 %v337_v60, %v336_v59  ;;  %v338_v10 = vld [vmem:[%s1992_s1 + $0xd0] sm:$0xff] }
   0xe   :  { %170 = vperm.xlu1 %1102, %v168_v35   ;;  %1001 = vmatprep.subr.bf16.mxu1 %v1000_v42  ;;  %v321_v5 = vld [vmem:[%s1992_s1 + $0x48] sm:$0xff]  ;;  %v352_v6 = vld [vmem:[%s1992_s1 + $0x140] sm:$0xff]  ;;  %v339_v11 = vld [vmem:[%s1992_s1 + $0xd8] sm:$0xff]  ;;  %v1008_v12 = vpack.c.bf16 %v369_v2, %v368_v1 }
   0xf   :  { %971 = vmatpush3.bf16.msra.mxu0 %v970_v50  ;;  %v353_v9 = vld [vmem:[%s1992_s1 + $0x148] sm:$0xff]  ;;  %v370_v0 = vld [vmem:[%s1992_s1 + $0x1d0] sm:$0xff]  ;;  %v371_v13 = vld [vmem:[%s1992_s1 + $0x1d8] sm:$0xff]  ;;  %v978_v14 = vpack.c.bf16 %v321_v5, %v320_v4  ;;  %v980_v17 = vpack.c.bf16 %v339_v11, %v338_v10 }
  0x10   :  { %1106 = vset.pattern.permute.xlu0 %v1141_v61  ;;  %1003 = vmatpush3.bf16.msra.mxu1 %v1002_v52  ;;  %v322_v15 = vld [vmem:[%s1992_s1 + $0x50] sm:$0xff]  ;;  %v1010_v16 = vpack.c.bf16 %v353_v9, %v352_v6  ;;  %v323_v18 = vld [vmem:[%s1992_s1 + $0x58] sm:$0xff]  ;;  %v1012_v21 = vpack.c.bf16 %v371_v13, %v370_v0  ;;  %v340_v22 = vld [vmem:[%s1992_s1 + $0xe0] sm:$0xff] }
  0x11   :  { %973 = vmatprep.subr.bf16.mxu0 %v972_v55  ;;  %1005 = vmatprep.subr.bf16.mxu1 %v1004_v56  ;;  %v354_v19 = vld [vmem:[%s1992_s1 + $0x150] sm:$0xff]  ;;  %v355_v20 = vld [vmem:[%s1992_s1 + $0x158] sm:$0xff]  ;;  %v341_v23 = vld [vmem:[%s1992_s1 + $0xe8] sm:$0xff] }
  0x12   :  { %1104 = vset.pattern.permute.xlu1 %v1142_v62 }
  0x13   :  { %242 = vperm.xlu1 %1104, %v240_v51   ;;  %975 = vmatpush3.bf16.msra.mxu0 %v974_v63 }
  0x14   :  { %1007 = vmatpush3.bf16.msra.mxu1 %v1006_v3  ;;  %977 = vmatprep.subr.bf16.mxu0 %v976_v8 }
  0x17   :  { %1105 = vset.pattern.permute.xlu1 %v1141_v61 }
  0x18   :  { %278 = vperm.xlu1 %1105, %v276_v7  }
  0x19   :  { %8 = vsyncpa [#allocation3], 0  ;;  %1009 = vmatprep.subr.bf16.mxu1 %v1008_v12  ;;  %v372_v24 = vld [vmem:[%s1992_s1 + $0x1e0] sm:$0xff]  ;;  %v373_v25 = vld [vmem:[%s1992_s1 + $0x1e8] sm:$0xff]  ;;  %979 = vmatpush3.bf16.msra.mxu0 %v978_v14  ;;  %v982_v26 = vpack.c.bf16 %v323_v18, %v322_v15  ;;  %v1014_v27 = vpack.c.bf16 %v355_v20, %v354_v19  ;;  %v984_v28 = vpack.c.bf16 %v341_v23, %v340_v22  ;;  %v16_v54 = vlaneseq }
  0x1a   :  { %1011 = vmatpush3.bf16.msra.mxu1 %v1010_v16  ;;  %981 = vmatprep.subr.bf16.mxu0 %v980_v17  ;;  %v324_v29 = vld [vmem:[%s1992_s1 + $0x60] sm:$0xff]  ;;  %v325_v30 = vld [vmem:[%s1992_s1 + $0x68] sm:$0xff]  ;;  %v1016_v32 = vpack.c.bf16 %v373_v25, %v372_v24  ;;  %v342_v34 = vld [vmem:[%s1992_s1 + $0xf0] sm:$0xff] }
  0x1b   :  { %v356_v31 = vld [vmem:[%s1992_s1 + $0x160] sm:$0xff]  ;;  %1013 = vmatprep.subr.bf16.mxu1 %v1012_v21  ;;  %v357_v33 = vld [vmem:[%s1992_s1 + $0x168] sm:$0xff]  ;;  %v343_v35 = vld [vmem:[%s1992_s1 + $0xf8] sm:$0xff]  ;;  %v986_v38 = vpack.c.bf16 %v325_v30, %v324_v29  ;;  %v1382_v55 = vand.u32 127, %v16_v54 }
  0x1c   :  { %v374_v36 = vld [vmem:[%s1992_s1 + $0x1f0] sm:$0xff]  ;;  %v375_v37 = vld [vmem:[%s1992_s1 + $0x1f8] sm:$0xff]  ;;  %v1018_v39 = vpack.c.bf16 %v357_v33, %v356_v31  ;;  %v988_v40 = vpack.c.bf16 %v343_v35, %v342_v34  ;;  %v392_v46 = vld [vmem:[%s1992_s1 + $0x280] sm:$0xff]  ;;  %v1143_v34 = vmov 0.0  }
  0x1d   :  { %983 = vmatpush3.bf16.msra.mxu0 %v982_v26  ;;  %v326_v41 = vld [vmem:[%s1992_s1 + $0x70] sm:$0xff]  ;;  %v327_v42 = vld [vmem:[%s1992_s1 + $0x78] sm:$0xff]  ;;  %v1020_v44 = vpack.c.bf16 %v375_v37, %v374_v36  ;;  %v393_v47 = vld [vmem:[%s1992_s1 + $0x288] sm:$0xff]  ;;  %v1435_v3 = vadd.s32 512, %v1382_v55  ;;  %v1453_v7 = vadd.s32 768, %v1382_v55  ;;  %v1456_v8 = vadd.s32 128, %v1382_v55 }
  0x1e   :  { %1015 = vmatpush3.bf16.msra.mxu1 %v1014_v27  ;;  %985 = vmatprep.subr.bf16.mxu0 %v984_v28  ;;  %v358_v43 = vld [vmem:[%s1992_s1 + $0x170] sm:$0xff]  ;;  %v359_v45 = vld [vmem:[%s1992_s1 + $0x178] sm:$0xff]  ;;  %v424_v48 = vld [vmem:[%s1992_s1 + $0x380] sm:$0xff]  ;;  %v990_v50 = vpack.c.bf16 %v327_v42, %v326_v41  ;;  %v1024_v52 = vpack.c.bf16 %v393_v47, %v392_v46  ;;  %v1459_v9 = vadd.s32 384, %v1382_v55  ;;  %v1477_v0 = vadd.s32 256, %v1382_v55 }
  0x1f   :  { %1017 = vmatprep.subr.bf16.mxu1 %v1016_v32  ;;  %v425_v49 = vld [vmem:[%s1992_s1 + $0x388] sm:$0xff]  ;;  %v1022_v51 = vpack.c.bf16 %v359_v45, %v358_v43  ;;  %v1387_v56 = vld [vmem:[%s1992_s1 + $0x200] sm:$0xff]  ;;  %v1407_v60 = vld [vmem:[%s1992_s1 + $0x290] sm:$0xff]  ;;  %v1482_v14 = vadd.s32 640, %v1382_v55  ;;  %v1485_v15 = vadd.s32 896, %v1382_v55 }
  0x20   :  { %v1056_v53 = vpack.c.bf16 %v425_v49, %v424_v48  ;;  %v1392_v57 = vld [vmem:[%s1992_s1 + $0x208] sm:$0xff]  ;;  %v1397_v58 = vld [vmem:[%s1992_s1 + $0x300] sm:$0xff]  ;;  %v1412_v61 = vld [vmem:[%s1992_s1 + $0x298] sm:$0xff] }
  0x21   :  { %987 = vmatpush3.bf16.msra.mxu0 %v986_v38  ;;  %v1402_v59 = vld [vmem:[%s1992_s1 + $0x308] sm:$0xff]  ;;  %v1417_v62 = vld [vmem:[%s1992_s1 + $0x390] sm:$0xff]  ;;  %v1422_v63 = vld [vmem:[%s1992_s1 + $0x398] sm:$0xff]  ;;  %v1026_v13 = vpack.c.bf16 %v1392_v57, %v1387_v56  ;;  %v1028_v21 = vpack.c.bf16 %v1412_v61, %v1407_v60 }
  0x22   :  { %1019 = vmatpush3.bf16.msra.mxu1 %v1018_v39  ;;  %989 = vmatprep.subr.bf16.mxu0 %v988_v40  ;;  %v1427_v1 = vld [vmem:[%s1992_s1 + $0x210] sm:$0xff]  ;;  %v1432_v2 = vld [vmem:[%s1992_s1 + $0x218] sm:$0xff]  ;;  %v1450_v6 = vld [vmem:[%s1992_s1 + $0x2a0] sm:$0xff]  ;;  %v1058_v20 = vpack.c.bf16 %v1402_v59, %v1397_v58  ;;  %v1060_v22 = vpack.c.bf16 %v1422_v63, %v1417_v62 }
  0x23   :  { %1021 = vmatprep.subr.bf16.mxu1 %v1020_v44  ;;  %v1440_v4 = vld [vmem:[%s1992_s1 + $0x310] sm:$0xff]  ;;  %v1445_v5 = vld [vmem:[%s1992_s1 + $0x318] sm:$0xff]  ;;  %v1464_v10 = vld [vmem:[%s1992_s1 + $0x2a8] sm:$0xff]  ;;  %v1030_v23 = vpack.c.bf16 %v1432_v2, %v1427_v1 }
  0x24   :  { %v1469_v11 = vld [vmem:[%s1992_s1 + $0x3a0] sm:$0xff]  ;;  %v1474_v12 = vld [vmem:[%s1992_s1 + $0x3a8] sm:$0xff]  ;;  %v1520_v25 = vld [vmem:[%s1992_s1 + $0x2b0] sm:$0xff]  ;;  %v1062_v28 = vpack.c.bf16 %v1445_v5, %v1440_v4  ;;  %v1032_v29 = vpack.c.bf16 %v1464_v10, %v1450_v6 }
  0x25   :  { %991 = vmatpush3.bf16.msra.mxu0 %v990_v50  ;;  %v1490_v16 = vld [vmem:[%s1992_s1 + $0x220] sm:$0xff]  ;;  %v1495_v17 = vld [vmem:[%s1992_s1 + $0x228] sm:$0xff]  ;;  %v1525_v26 = vld [vmem:[%s1992_s1 + $0x2b8] sm:$0xff]  ;;  %v1995_v5 = vpack.c.bf16 %v1474_v12, %v1469_v11 }
  0x26   :  { %1023 = vmatpush3.bf16.msra.mxu1 %v1022_v51  ;;  %1025 = vmatprep.subr.bf16.mxu0 %v1024_v52  ;;  %v1500_v18 = vld [vmem:[%s1992_s1 + $0x320] sm:$0xff]  ;;  %v1515_v24 = vld [vmem:[%s1992_s1 + $0x328] sm:$0xff] }
  0x27   :  { %1057 = vmatprep.subr.bf16.mxu1 %v1056_v53  ;;  %v400_v62 = vld [vmem:[%s1992_s1 + $0x2c0] sm:$0xff]  ;;  %v401_v6 = vld [vmem:[%s1992_s1 + $0x2c8] sm:$0xff] }
  0x28   :  { %v432_v10 = vld [vmem:[%s1992_s1 + $0x3c0] sm:$0xff] }
  0x81   :  { %v1502_v19 = vpop.permute.xlu0 %26 }
  0x82   :  { %vm29_vm0 = vcmp.eq.s32.totalorder %v1456_v8, %v1502_v19  ;;  %vm31_vm1 = vcmp.eq.s32.totalorder %v1459_v9, %v1502_v19  ;;  %vm28_vm4 = vcmp.eq.s32.totalorder %v1382_v55, %v1502_v19  ;;  %vm30_vm6 = vcmp.eq.s32.totalorder %v1477_v0, %v1502_v19 }
  0x83   :  { %v1527_v27 = vpop.permute.xlu1 %98  ;;  %v756_v35 = vsel %vm29_vm0, 1.0, %v1143_v34  ;;  %v758_v36 = vsel %vm31_vm1, 1.0, %v1143_v34  ;;  %v755_v40 = vsel %vm28_vm4, 1.0, %v1143_v34  ;;  %v757_v43 = vsel %vm30_vm6, 1.0, %v1143_v34 }
  0x84   :  { %vm101_vm2 = vcmp.eq.s32.totalorder %v1456_v8, %v1527_v27  ;;  %vm103_vm3 = vcmp.eq.s32.totalorder %v1459_v9, %v1527_v27  ;;  %vm100_vm5 = vcmp.eq.s32.totalorder %v1382_v55, %v1527_v27  ;;  %vm102_vm7 = vcmp.eq.s32.totalorder %v1477_v0, %v1527_v27 }
  0x85   :  { %v772_v38 = vsel %vm101_vm2, 1.0, %v1143_v34  ;;  %v774_v39 = vsel %vm103_vm3, 1.0, %v1143_v34  ;;  %v771_v41 = vsel %vm100_vm5, 1.0, %v1143_v34  ;;  %v773_v44 = vsel %vm102_vm7, 1.0, %v1143_v34 }
  0x86   :  { %v1559_v37 = vpop.permute.xlu0 %62  ;;  %vm33_vm0 = vcmp.eq.s32.totalorder %v1482_v14, %v1502_v19 }
  0x87   :  { %vm65_vm8 = vcmp.eq.s32.totalorder %v1456_v8, %v1559_v37  ;;  %vm67_vm9 = vcmp.eq.s32.totalorder %v1459_v9, %v1559_v37  ;;  %vm64_vm12 = vcmp.eq.s32.totalorder %v1382_v55, %v1559_v37  ;;  %vm66_vm14 = vcmp.eq.s32.totalorder %v1477_v0, %v1559_v37 }
  0x88   :  { %v1565_v42 = vpop.permute.xlu1 %134  ;;  %v764_v45 = vsel %vm65_vm8, 1.0, %v1143_v34  ;;  %v766_v46 = vsel %vm67_vm9, 1.0, %v1143_v34  ;;  %v763_v54 = vsel %vm64_vm12, 1.0, %v1143_v34 }
  0x89   :  { %vm137_vm10 = vcmp.eq.s32.totalorder %v1456_v8, %v1565_v42  ;;  %vm139_vm11 = vcmp.eq.s32.totalorder %v1459_v9, %v1565_v42  ;;  %v89_v47 = vadd.f32 %v764_v45, %v756_v35  ;;  %v91_v49 = vadd.f32 %v766_v46, %v758_v36 }
  0x8a   :  { %v780_v48 = vsel %vm137_vm10, 1.0, %v1143_v34  ;;  %v782_v50 = vsel %vm139_vm11, 1.0, %v1143_v34  ;;  %vm136_vm13 = vcmp.eq.s32.totalorder %v1382_v55, %v1565_v42  ;;  %vm138_vm15 = vcmp.eq.s32.totalorder %v1477_v0, %v1565_v42 }
  0x8b   :  { %v1589_v51 = vpop.permute.xlu0 %206  ;;  %v125_v52 = vadd.f32 %v772_v38, %v89_v47  ;;  %v127_v53 = vadd.f32 %v774_v39, %v91_v49  ;;  %v779_v35 = vsel %vm136_vm13, 1.0, %v1143_v34  ;;  %v88_v45 = vadd.f32 %v763_v54, %v755_v40 }
  0x8c   :  { %vm209_vm1 = vcmp.eq.s32.totalorder %v1456_v8, %v1589_v51  ;;  %vm211_vm2 = vcmp.eq.s32.totalorder %v1459_v9, %v1589_v51  ;;  %vm208_vm3 = vcmp.eq.s32.totalorder %v1382_v55, %v1589_v51  ;;  %vm210_vm11 = vcmp.eq.s32.totalorder %v1477_v0, %v1589_v51 }
  0x8d   :  { %v1595_v36 = vpop.permute.xlu1 %170  ;;  %v161_v38 = vadd.f32 %v780_v48, %v125_v52  ;;  %v796_v39 = vsel %vm209_vm1, 1.0, %v1143_v34  ;;  %v163_v46 = vadd.f32 %v782_v50, %v127_v53  ;;  %v798_v49 = vsel %vm211_vm2, 1.0, %v1143_v34 }
  0x8e   :  { %vm173_vm4 = vcmp.eq.s32.totalorder %v1456_v8, %v1595_v36  ;;  %vm175_vm5 = vcmp.eq.s32.totalorder %v1459_v9, %v1595_v36  ;;  %v124_v32 = vadd.f32 %v771_v41, %v88_v45  ;;  %vm172_vm6 = vcmp.eq.s32.totalorder %v1382_v55, %v1595_v36 }
  0x8f   :  { %v788_v47 = vsel %vm173_vm4, 1.0, %v1143_v34  ;;  %v790_v40 = vsel %vm175_vm5, 1.0, %v1143_v34  ;;  %v795_v48 = vsel %vm208_vm3, 1.0, %v1143_v34  ;;  %v787_v50 = vsel %vm172_vm6, 1.0, %v1143_v34 }
  0x90   :  { %v197_v33 = vadd.f32 %v788_v47, %v161_v38  ;;  %v199_v52 = vadd.f32 %v790_v40, %v163_v46  ;;  %v160_v54 = vadd.f32 %v779_v35, %v124_v32  ;;  %v765_v53 = vsel %vm66_vm14, 1.0, %v1143_v34 }
  0x91   :  { %v90_v45 = vadd.f32 %v765_v53, %v757_v43  ;;  %v781_v38 = vsel %vm138_vm15, 1.0, %v1143_v34  ;;  %vm174_vm7 = vcmp.eq.s32.totalorder %v1477_v0, %v1595_v36  ;;  %vm69_vm1 = vcmp.eq.s32.totalorder %v1482_v14, %v1559_v37 }
  0x92   :  { %v1619_v31 = vpop.permute.xlu1 %242  ;;  %v233_v41 = vadd.f32 %v796_v39, %v197_v33  ;;  %v235_v32 = vadd.f32 %v798_v49, %v199_v52  ;;  %v196_v35 = vadd.f32 %v787_v50, %v160_v54  ;;  %v789_v49 = vsel %vm174_vm7, 1.0, %v1143_v34 }
  0x93   :  { %vm245_vm8 = vcmp.eq.s32.totalorder %v1456_v8, %v1619_v31  ;;  %vm247_vm9 = vcmp.eq.s32.totalorder %v1459_v9, %v1619_v31  ;;  %vm244_vm10 = vcmp.eq.s32.totalorder %v1382_v55, %v1619_v31  ;;  %v126_v43 = vadd.f32 %v773_v44, %v90_v45  ;;  %v1658_v45 = vld [vmem:[%s1992_s1 + $0x3b0] sm:$0xff] }
  0x94   :  { %v804_v46 = vsel %vm245_vm8, 1.0, %v1143_v34  ;;  %v806_v33 = vsel %vm247_vm9, 1.0, %v1143_v34  ;;  %v232_v40 = vadd.f32 %v795_v48, %v196_v35  ;;  %v803_v53 = vsel %vm244_vm10, 1.0, %v1143_v34 }
  0x95   :  { %v269_v39 = vadd.f32 %v804_v46, %v233_v41  ;;  %v271_v47 = vadd.f32 %v806_v33, %v235_v32  ;;  %v162_v30 = vadd.f32 %v781_v38, %v126_v43  ;;  %vm246_vm12 = vcmp.eq.s32.totalorder %v1477_v0, %v1619_v31 }
  0x96   :  { %v268_v54 = vadd.f32 %v803_v53, %v232_v40  ;;  %v797_v50 = vsel %vm210_vm11, 1.0, %v1143_v34  ;;  %v805_v44 = vsel %vm246_vm12, 1.0, %v1143_v34  ;;  %v760_v48 = vsel %vm33_vm0, 1.0, %v1143_v34  ;;  %v1688_v40 = vld [vmem:[%s1992_s1 + $0x338] sm:$0xff] }
  0x97   :  { %v1641_v52 = vpop.permute.xlu1 %278  ;;  %v198_v41 = vadd.f32 %v789_v49, %v162_v30  ;;  %vm105_vm2 = vcmp.eq.s32.totalorder %v1482_v14, %v1527_v27  ;;  %vm141_vm3 = vcmp.eq.s32.totalorder %v1482_v14, %v1565_v42  ;;  %vm32_vm4 = vcmp.eq.s32.totalorder %v1435_v3, %v1502_v19 }
  0x98   :  { %vm281_vm13 = vcmp.eq.s32.totalorder %v1456_v8, %v1641_v52  ;;  %vm283_vm14 = vcmp.eq.s32.totalorder %v1459_v9, %v1641_v52  ;;  %vm280_vm15 = vcmp.eq.s32.totalorder %v1382_v55, %v1641_v52  ;;  %vm282_vm0 = vcmp.eq.s32.totalorder %v1477_v0, %v1641_v52  ;;  %v1668_v8 = vld [vmem:[%s1992_s1 + $0x3b8] sm:$0xff]  ;;  %v1673_v55 = vld [vmem:[%s1992_s1 + $0x230] sm:$0xff] }
  0x99   :  { %v812_v38 = vsel %vm281_vm13, 1.0, %v1143_v34  ;;  %v814_v32 = vsel %vm283_vm14, 1.0, %v1143_v34  ;;  %v811_v35 = vsel %vm280_vm15, 1.0, %v1143_v34  ;;  %v1678_v9 = vld [vmem:[%s1992_s1 + $0x238] sm:$0xff]  ;;  %v234_v43 = vadd.f32 %v797_v50, %v198_v41  ;;  %v1683_v0 = vld [vmem:[%s1992_s1 + $0x330] sm:$0xff] }
  0x9a   :  { %v305_v30 = vadd.f32 %v812_v38, %v269_v39  ;;  %v307_v46 = vadd.f32 %v814_v32, %v271_v47  ;;  %v304_v33 = vadd.f32 %v811_v35, %v268_v54  ;;  %v813_v53 = vsel %vm282_vm0, 1.0, %v1143_v34 }
  0x9b   :  { %v270_v39 = vadd.f32 %v805_v44, %v234_v43  ;;  %v768_v47 = vsel %vm69_vm1, 1.0, %v1143_v34  ;;  %v1068_v49 = vpack.c.bf16 %v1668_v8, %v1658_v45  ;;  %v1038_v54 = vpack.c.bf16 %v1678_v9, %v1673_v55  ;;  %v387_v55 = vld [vmem:[%s1992_s1 + $0x258] sm:$0xff] }
  0x9c   :  { %511 = vmatprep.mubr.f32.mxu0 %v305_v30  ;;  %581 = vmatprep.mubr.f32.mxu1 %v307_v46  ;;  %v93_v50 = vadd.f32 %v768_v47, %v760_v48  ;;  %vm177_vm5 = vcmp.eq.s32.totalorder %v1482_v14, %v1595_v36  ;;  %v1070_v41 = vpack.c.bf16 %v1688_v40, %v1683_v0  ;;  %v776_v38 = vsel %vm105_vm2, 1.0, %v1143_v34  ;;  %v418_v0 = vld [vmem:[%s1992_s1 + $0x350] sm:$0xff]  ;;  %v419_v40 = vld [vmem:[%s1992_s1 + $0x358] sm:$0xff] }
  0x9d   :  { %512 = vmatmul.mubr.f32.vlgmr.msra.gmra.mrb[0].mxu0 %v304_v33  ;;  %v306_v44 = vadd.f32 %v813_v53, %v270_v39  ;;  %v784_v32 = vsel %vm141_vm3, 1.0, %v1143_v34  ;;  %vm213_vm6 = vcmp.eq.s32.totalorder %v1482_v14, %v1589_v51  ;;  %vm249_vm7 = vcmp.eq.s32.totalorder %v1482_v14, %v1619_v31 }
  0x9e   :  { %1027 = vmatpush3.bf16.msra.mxu0 %v1026_v13  ;;  %v129_v35 = vadd.f32 %v776_v38, %v93_v50  ;;  %vm35_vm8 = vcmp.eq.s32.totalorder %v1485_v15, %v1502_v19  ;;  %vm71_vm9 = vcmp.eq.s32.totalorder %v1485_v15, %v1559_v37  ;;  %v792_v56 = vsel %vm177_vm5, 1.0, %v1143_v34 }
  0x9f   :  { %1029 = vmatprep.subr.bf16.mxu0 %v1028_v21  ;;  %582 = vmatmul.mubr.f32.vlgmr.msra.gmra.mrb[0].mxu1 %v306_v44  ;;  %v762_v57 = vsel %vm35_vm8, 1.0, %v1143_v34  ;;  %v770_v13 = vsel %vm71_vm9, 1.0, %v1143_v34  ;;  %vm107_vm10 = vcmp.eq.s32.totalorder %v1485_v15, %v1527_v27  ;;  %vm68_vm11 = vcmp.eq.s32.totalorder %v1435_v3, %v1559_v37 }
  0xa0   :  { %1059 = vmatpush3.bf16.msra.mxu1 %v1058_v20  ;;  %v165_v48 = vadd.f32 %v784_v32, %v129_v35  ;;  %v95_v60 = vadd.f32 %v770_v13, %v762_v57  ;;  %vm143_vm12 = vcmp.eq.s32.totalorder %v1485_v15, %v1565_v42  ;;  %v800_v61 = vsel %vm213_vm6, 1.0, %v1143_v34 }
  0xa1   :  { %v808_v21 = vsel %vm249_vm7, 1.0, %v1143_v34  ;;  %v778_v30 = vsel %vm107_vm10, 1.0, %v1143_v34  ;;  %vm179_vm13 = vcmp.eq.s32.totalorder %v1485_v15, %v1595_v36  ;;  %1061 = vmatprep.subr.bf16.mxu1 %v1060_v22  ;;  %vm285_vm14 = vcmp.eq.s32.totalorder %v1482_v14, %v1641_v52 }
  0xa2   :  { %v201_v58 = vadd.f32 %v792_v56, %v165_v48  ;;  %v131_v59 = vadd.f32 %v778_v30, %v95_v60  ;;  %vm215_vm15 = vcmp.eq.s32.totalorder %v1485_v15, %v1589_v51  ;;  %1031 = vmatpush3.bf16.msra.mxu0 %v1030_v23  ;;  %v786_v20 = vsel %vm143_vm12, 1.0, %v1143_v34  ;;  %v433_v23 = vld [vmem:[%s1992_s1 + $0x3c8] sm:$0xff]  ;;  %v435_v56 = vld [vmem:[%s1992_s1 + $0x3d8] sm:$0xff]  ;;  %v404_v48 = vld [vmem:[%s1992_s1 + $0x2e0] sm:$0xff] }
  0xa3   :  { %v794_v46 = vsel %vm179_vm13, 1.0, %v1143_v34  ;;  %1033 = vmatprep.subr.bf16.mxu0 %v1032_v29  ;;  %v759_v63 = vsel %vm32_vm4, 1.0, %v1143_v34  ;;  %v767_v1 = vsel %vm68_vm11, 1.0, %v1143_v34  ;;  %vm251_vm0 = vcmp.eq.s32.totalorder %v1485_v15, %v1619_v31  ;;  %v405_v60 = vld [vmem:[%s1992_s1 + $0x2e8] sm:$0xff] }
  0xa4   :  { %v237_v2 = vadd.f32 %v800_v61, %v201_v58  ;;  %v167_v22 = vadd.f32 %v786_v20, %v131_v59  ;;  %vm287_vm1 = vcmp.eq.s32.totalorder %v1485_v15, %v1641_v52  ;;  %1063 = vmatpush3.bf16.msra.mxu1 %v1062_v28  ;;  %v816_v29 = vsel %vm285_vm14, 1.0, %v1143_v34  ;;  %v436_v59 = vld [vmem:[%s1992_s1 + $0x3e0] sm:$0xff]  ;;  %v437_v20 = vld [vmem:[%s1992_s1 + $0x3e8] sm:$0xff] }
  0xa5   :  { %v802_v4 = vsel %vm215_vm15, 1.0, %v1143_v34  ;;  %1065 = vmatprep.subr.bf16.mxu1 %v1995_v5  ;;  %v92_v28 = vadd.f32 %v767_v1, %v759_v63  ;;  %vm104_vm2 = vcmp.eq.s32.totalorder %v1435_v3, %v1527_v27  ;;  %vm34_vm3 = vcmp.eq.s32.totalorder %v1453_v7, %v1502_v19  ;;  %v434_v19 = vld [vmem:[%s1992_s1 + $0x3d0] sm:$0xff]  ;;  %v388_v1 = vld [vmem:[%s1992_s1 + $0x260] sm:$0xff]  ;;  %v421_v5 = vld [vmem:[%s1992_s1 + $0x368] sm:$0xff] }
  0xa6   :  { %vm70_vm4 = vcmp.eq.s32.totalorder %v1453_v7, %v1559_v37  ;;  %v273_v14 = vadd.f32 %v808_v21, %v237_v2  ;;  %v203_v33 = vadd.f32 %v794_v46, %v167_v22  ;;  %v1996_v43 = vpack.c.bf16 %v1495_v17, %v1490_v16  ;;  %v384_v16 = vld [vmem:[%s1992_s1 + $0x240] sm:$0xff]  ;;  %v385_v17 = vld [vmem:[%s1992_s1 + $0x248] sm:$0xff] }
  0xa7   :  { %v810_v11 = vsel %vm251_vm0, 1.0, %v1143_v34  ;;  %v818_v12 = vsel %vm287_vm1, 1.0, %v1143_v34  ;;  %v1997_v53 = vpack.c.bf16 %v1525_v26, %v1520_v25  ;;  %v1040_v39 = vpack.c.bf16 %v401_v6, %v400_v62  ;;  %v402_v25 = vld [vmem:[%s1992_s1 + $0x2d0] sm:$0xff]  ;;  %v403_v26 = vld [vmem:[%s1992_s1 + $0x2d8] sm:$0xff]  ;;  %v389_v2 = vld [vmem:[%s1992_s1 + $0x268] sm:$0xff] }
  0xa8   :  { %1035 = vmatpush3.bf16.msra.mxu0 %v1996_v43  ;;  %v1072_v47 = vpack.c.bf16 %v433_v23, %v432_v10  ;;  %v309_v50 = vadd.f32 %v816_v29, %v273_v14  ;;  %v239_v44 = vadd.f32 %v802_v4, %v203_v33  ;;  %v1998_v15 = vpack.c.bf16 %v1515_v24, %v1500_v18  ;;  %v416_v18 = vld [vmem:[%s1992_s1 + $0x340] sm:$0xff]  ;;  %v417_v24 = vld [vmem:[%s1992_s1 + $0x348] sm:$0xff]  ;;  %v407_v10 = vld [vmem:[%s1992_s1 + $0x2f8] sm:$0xff] }
  0xa9   :  { %1037 = vmatprep.subr.bf16.mxu0 %v1997_v53  ;;  %v775_v38 = vsel %vm104_vm2, 1.0, %v1143_v34  ;;  %vm140_vm5 = vcmp.eq.s32.totalorder %v1435_v3, %v1565_v42  ;;  %v761_v35 = vsel %vm34_vm3, 1.0, %v1143_v34  ;;  %v769_v45 = vsel %vm70_vm4, 1.0, %v1143_v34  ;;  %v420_v4 = vld [vmem:[%s1992_s1 + $0x360] sm:$0xff]  ;;  %v439_v33 = vld [vmem:[%s1992_s1 + $0x3f8] sm:$0xff] }
  0xaa   :  { %1067 = vmatpush3.bf16.msra.mxu1 %v1998_v15  ;;  %v128_v32 = vadd.f32 %v775_v38, %v92_v28  ;;  %vm106_vm6 = vcmp.eq.s32.totalorder %v1453_v7, %v1527_v27  ;;  %651 = vmatprep.mubr.f32.mxu0 %v309_v50  ;;  %v275_v8 = vadd.f32 %v810_v11, %v239_v44  ;;  %v386_v27 = vld [vmem:[%s1992_s1 + $0x250] sm:$0xff]  ;;  %v783_v61 = vsel %vm140_vm5, 1.0, %v1143_v34  ;;  %v391_v53 = vld [vmem:[%s1992_s1 + $0x278] sm:$0xff] }
  0xab   :  { %1069 = vmatprep.subr.bf16.mxu1 %v1068_v49  ;;  %v1042_v49 = vpack.c.bf16 %v385_v17, %v384_v16  ;;  %v94_v37 = vadd.f32 %v769_v45, %v761_v35  ;;  %v1044_v57 = vpack.c.bf16 %v403_v26, %v402_v25  ;;  %vm176_vm7 = vcmp.eq.s32.totalorder %v1435_v3, %v1595_v36  ;;  %v422_v17 = vld [vmem:[%s1992_s1 + $0x370] sm:$0xff]  ;;  %v423_v50 = vld [vmem:[%s1992_s1 + $0x378] sm:$0xff] }
  0xac   :  { %1039 = vmatpush3.bf16.msra.mxu0 %v1038_v54  ;;  %v777_v9 = vsel %vm106_vm6, 1.0, %v1143_v34  ;;  %vm142_vm8 = vcmp.eq.s32.totalorder %v1453_v7, %v1565_v42  ;;  %v311_v54 = vadd.f32 %v818_v12, %v275_v8  ;;  %v1074_v13 = vpack.c.bf16 %v417_v24, %v416_v18  ;;  %v406_v42 = vld [vmem:[%s1992_s1 + $0x2f0] sm:$0xff] }
  0xad   :  { %1041 = vmatprep.subr.bf16.mxu0 %v1040_v39  ;;  %v130_v21 = vadd.f32 %v777_v9, %v94_v37  ;;  %v1076_v30 = vpack.c.bf16 %v435_v56, %v434_v19  ;;  %vm178_vm9 = vcmp.eq.s32.totalorder %v1453_v7, %v1595_v36  ;;  %v1046_v58 = vpack.c.bf16 %v387_v55, %v386_v27  ;;  %v438_v36 = vld [vmem:[%s1992_s1 + $0x3f0] sm:$0xff] }
  0xae   :  { %1071 = vmatpush3.bf16.msra.mxu1 %v1070_v41  ;;  %v164_v41 = vadd.f32 %v783_v61, %v128_v32  ;;  %721 = vmatprep.mubr.f32.mxu1 %v311_v54  ;;  %v791_v46 = vsel %vm176_vm7, 1.0, %v1143_v34  ;;  %v785_v62 = vsel %vm142_vm8, 1.0, %v1143_v34  ;;  %v1048_v63 = vpack.c.bf16 %v405_v60, %v404_v48  ;;  %v390_v12 = vld [vmem:[%s1992_s1 + $0x270] sm:$0xff] }
  0xaf   :  { %1073 = vmatprep.subr.bf16.mxu1 %v1072_v47  ;;  %vm212_vm10 = vcmp.eq.s32.totalorder %v1435_v3, %v1589_v51  ;;  %v166_v22 = vadd.f32 %v785_v62, %v130_v21  ;;  %v1078_v6 = vpack.c.bf16 %v419_v40, %v418_v0  ;;  %v793_v23 = vsel %vm178_vm9, 1.0, %v1143_v34 }
  0xb0   :  { %1043 = vmatpush3.bf16.msra.mxu0 %v1042_v49  ;;  %v1080_v29 = vpack.c.bf16 %v437_v20, %v436_v59  ;;  %v200_v28 = vadd.f32 %v791_v46, %v164_v41  ;;  %vm214_vm11 = vcmp.eq.s32.totalorder %v1453_v7, %v1589_v51  ;;  %v1050_v14 = vpack.c.bf16 %v389_v2, %v388_v1 }
  0xb1   :  { %1045 = vmatprep.subr.bf16.mxu0 %v1044_v57  ;;  %v799_v43 = vsel %vm212_vm10, 1.0, %v1143_v34  ;;  %v1052_v11 = vpack.c.bf16 %v407_v10, %v406_v42  ;;  %vm248_vm12 = vcmp.eq.s32.totalorder %v1435_v3, %v1619_v31  ;;  %v202_v39 = vadd.f32 %v793_v23, %v166_v22 }
  0xb2   :  { %1075 = vmatpush3.bf16.msra.mxu1 %v1074_v13  ;;  %v1082_v47 = vpack.c.bf16 %v421_v5, %v420_v4  ;;  %v801_v16 = vsel %vm214_vm11, 1.0, %v1143_v34  ;;  %v1084_v51 = vpack.c.bf16 %v439_v33, %v438_v36  ;;  %v236_v44 = vadd.f32 %v799_v43, %v200_v28 }
  0xb3   :  { %1077 = vmatprep.subr.bf16.mxu1 %v1076_v30  ;;  %vm284_vm13 = vcmp.eq.s32.totalorder %v1435_v3, %v1641_v52  ;;  %vm250_vm14 = vcmp.eq.s32.totalorder %v1453_v7, %v1619_v31  ;;  %v1054_v15 = vpack.c.bf16 %v391_v53, %v390_v12  ;;  %v807_v25 = vsel %vm248_vm12, 1.0, %v1143_v34 }
  0xb4   :  { %1047 = vmatpush3.bf16.msra.mxu0 %v1046_v58  ;;  %v238_v26 = vadd.f32 %v801_v16, %v202_v39  ;;  %vm286_vm15 = vcmp.eq.s32.totalorder %v1453_v7, %v1641_v52  ;;  %v1086_v38 = vpack.c.bf16 %v423_v50, %v422_v17  ;;  %v815_v18 = vsel %vm284_vm13, 1.0, %v1143_v34  ;;  %v819_v7 = vld [vmem:[%s1993_s2] ss:$0 sm:$0xff]  ;;  %s1144_s2 = smov [#allocation2]  }
  0xb5   :  { %1049 = vmatprep.subr.bf16.mxu0 %v1048_v63  ;;  %v809_v24 = vsel %vm250_vm14, 1.0, %v1143_v34  ;;  %v272_v3 = vadd.f32 %v807_v25, %v236_v44  ;;  %v817_v31 = vsel %vm286_vm15, 1.0, %v1143_v34  ;;  %vm727_vm0 = vcmask 17408   ;;  %s747_s19 = sshll.u32 %s1144_s2, 4  ;;  %s748_s19 = int_to_ptr.vmem [resolvable:$true] %s747_s19 }
  0xb6   :  { %1079 = vmatpush3.bf16.msra.mxu1 %v1078_v6  ;;  %v274_v35 = vadd.f32 %v809_v24, %v238_v26  ;;  %s1111_s0 = scalar_lea.vmem %s748_s19, 32  ;;  %p1116_p1 = scmp.lt.s32.totalorder %s748_s19, %s748_s19 }
  0xb7   :  { %1081 = vmatprep.subr.bf16.mxu1 %v1080_v29  ;;  %v308_v32 = vadd.f32 %v815_v18, %v272_v3  ;;  %p1112_p0 = scmp.ne.s32.totalorder %s748_s19, %s1111_s0  ;;  %p1117_p2 = scmp.lt.s32.totalorder %s1111_s0, %s1111_s0 }
  0xb8   :  { %1051 = vmatpush3.bf16.msra.mxu0 %v1050_v14  ;;  %v310_v45 = vadd.f32 %v817_v31, %v274_v35 }
  0xb9   :  { %1053 = vmatprep.subr.bf16.mxu0 %v1052_v11  ;;  %p1118_p3 = por %p1117_p2, %p1116_p1 }
  0xba   :  { %1083 = vmatpush3.bf16.msra.mxu1 %v1082_v47 }
  0xbb   :  { %1085 = vmatprep.subr.bf16.mxu1 %v1084_v51  ;;  %p1119_p4 = pnand %p1118_p3, %p1112_p0 }
  0xbc   :  { %1055 = vmatpush3.bf16.msra.mxu0 %v1054_v15 }
  0xbe   :  { %1087 = vmatpush3.bf16.msra.mxu1 %v1086_v38 }
  0xbf   :  { %652 = vmatmul.mubr.f32.vlgmr.msra.gmra.mrb[2].mxu0 %v308_v32 }
  0xc1   :  { %722 = vmatmul.mubr.f32.vlgmr.msra.gmra.mrb[2].mxu1 %v310_v45 }
 0x170   :  { %v852_v8 = vpop.f32.mrb[0].mxu0 }
 0x171   :  { %v853_v52 = vpop.f32.mrb[1].mxu0 }
 0x172   :  { %v854_v49 = vadd.f32 %v853_v52, %v852_v8  ;;  %v887_v19 = vpop.f32.mrb[0].mxu1 }
 0x173   :  { %v888_v37 = vpop.f32.mrb[1].mxu1 }
 0x174   :  { %v514_v56 = vadd.f32 %v854_v49, %v819_v7  ;;  %v889_v57 = vadd.f32 %v888_v37, %v887_v19 }
 0x176   :  { %v584_v27 = vadd.f32 %v889_v57, %v514_v56 }
 0x192   :  { %v922_v55 = vpop.f32.mrb[2].mxu0 }
 0x193   :  { %v923_v34 = vpop.f32.mrb[3].mxu0 }
 0x194   :  { %v957_v9 = vpop.f32.mrb[2].mxu1  ;;  %v924_v54 = vadd.f32 %v923_v34, %v922_v55 }
 0x195   :  { %v958_v13 = vpop.f32.mrb[3].mxu1 }
 0x196   :  { %v654_v48 = vadd.f32 %v924_v54, %v584_v27  ;;  %v959_v60 = vadd.f32 %v958_v13, %v957_v9 }
 0x198   :  { %v724_v61 = vadd.f32 %v959_v60, %v654_v48 }
 0x19a   :  { %v728_v21 = vsel %vm727_vm0, %v724_v61, -inf }
 0x19b   :  { %729 = vmax.xlane.f32.xlu0 %v728_v21 }
 0x228   :  { %v730_v30 = vpop.xlane.xlu0 %729 }
 0x229   :  { %v731_v0 = vsub.f32 %v724_v61, %v730_v30 }
 0x22b   :  { %v732_v40 = vmul.f32 1.442695, %v731_v0 }
 0x22d   :  { %1107 = vpow2.f32 %v732_v40 }
 0x237   :  { %v1108_v41 = vpop.eup %1107 }
 0x238   :  { %v734_v58 = vsel %vm727_vm0, %v1108_v41, 0.0 }
 0x239   :  { %735 = vadd.xlane.f32.xlu1 %v734_v58 }
 0x2c6   :  { %v736_v59 = vpop.xlane.xlu1 %735 }
 0x2c7   :  { %1109 = vlog2.f32 %v736_v59 }
 0x2d1   :  { %v1110_v20 = vpop.eup %1109 }
 0x2d2   :  { %v738_v46 = vmul.f32 0.6931472, %v1110_v20 }
 0x2d4   :  { %v739_v62 = vsub.f32 %v731_v0, %v738_v46 }
 0x2d6   :  { %740 = vst.msk [vmem:[#allocation2] sm:$0x3] %vm727_vm0, %v739_v62 }
 0x2d7   :  { %1122 = shalt.err (!%p1119_p4)
}
 0x2d8   :  { %s1123_s22 = scalar_lea.hbm %s1994_s3, 32 }
 0x2d9   :  { %p1124_p5 = scmp.ne.s32.totalorder %s1994_s3, %s1123_s22  ;;  %p1127_p6 = scmp.lt.u32.totalorder %s1123_s22, %s1994_s3 }
 0x2db   :  { %p1129_p7 = pnand %p1127_p6, %p1124_p5 }
 0x2dd   :  { %1132 = shalt.err (!%p1129_p7)
}
 0x2de   :  { %750 = dma.vmem_to_hbm [thread:$0]  %s748_s19, 32, %s1994_s3, [#allocation3]  }
 0x2df   :  { %1133 = dma.done.wait [#allocation3], 32  }
 0x2e0   :  { %1134 = vsyncadd [#allocation3], 4294967264 }
 0x2e1   :  { %754 = vsyncpa [#allocation3], 1 }

</bundles_post_ra>
